<compile_context>
chip_gen: v6e
topology: v6e:2x2x1
jax: 0.10.0
libtpu: 0.0.40
codegen_flags: <defaults>
</compile_context>

<pallas_src>
import math
from functools import partial

import numpy as np
import jax
import jax.numpy as jnp
from jax.experimental import pallas as pl
from jax.experimental.pallas import tpu as pltpu

_BF16 = jnp.bfloat16


def _default_vmem_limit():
    try:
        info = pltpu.get_tpu_info()
        cap = int(getattr(info, "vmem_capacity_bytes", 0) or 0)
        if cap > 0:
            return min((cap * 3) // 4, 100 * 1024 * 1024)
    except Exception:
        pass
    return 48 * 1024 * 1024


_VMEM_LIMIT = _default_vmem_limit()
_TK_CAP = 1024 if _VMEM_LIMIT >= 80 * 1024 * 1024 else 512


def _round_up(x, m):
    return ((x + m - 1) // m) * m


def _pick_tile128(d, cap):
    """Multiple-of-128 tile <= cap minimising zero padding (prefer larger tiles)."""
    best_t, best_p = 128, _round_up(d, 128)
    t = 256
    while t <= cap:
        p = _round_up(d, t)
        if p < best_p or (p == best_p and t > best_t):
            best_t, best_p = t, p
        t += 128
    return best_t


# ----------------------------- Pallas kernels ------------------------------

def _mm_kernel(*refs, nk, act, epilogue, has_bn):
    """Tiled matmul with K-reduction accumulator + folded BN + act + epilogue."""
    x_ref, w_ref = refs[0], refs[1]
    idx = 2
    if has_bn:
        s_ref, b_ref = refs[idx], refs[idx + 1]
        idx += 2
    if epilogue is not None:
        res_ref = refs[idx]
        idx += 1
    o_ref, acc_ref = refs[idx], refs[idx + 1]

    @pl.when(pl.program_id(2) == 0)
    def _init():
        acc_ref[...] = jnp.zeros_like(acc_ref)

    acc_ref[...] += jnp.dot(x_ref[...], w_ref[...],
                            preferred_element_type=jnp.float32)

    @pl.when(pl.program_id(2) == nk - 1)
    def _fin():
        y = acc_ref[...]
        if has_bn:
            y = y * s_ref[...] + b_ref[...]
        if act == "relu":
            y = jnp.maximum(y, 0.0)
        elif act == "sigmoid":
            y = jax.nn.sigmoid(y)
        if epilogue == "add_relu":
            y = jnp.maximum(y + res_ref[...].astype(jnp.float32), 0.0)
        elif epilogue == "add":
            y = y + res_ref[...].astype(jnp.float32)
        elif epilogue == "mul":
            y = y * res_ref[...].astype(jnp.float32)
        o_ref[...] = y.astype(o_ref.dtype)


def _conv3s1_kernel(x0_ref, x1_ref, x2_ref, w_ref, s_ref, b_ref, o_ref, *, wo, relu):
    """Direct 3x3 stride-1 conv for one output row: 9 MXU matmuls + BN + relu.
    x*_ref: (1,1,Wp,C) bf16 rows (h, h+1, h+2 of padded input); w_ref: (9,C,cout)."""
    rows = (x0_ref[0, 0], x1_ref[0, 0], x2_ref[0, 0])
    acc = None
    for dy in range(3):
        for dx in range(3):
            part = jnp.dot(rows[dy][dx:dx + wo, :], w_ref[dy * 3 + dx],
                           preferred_element_type=jnp.float32)
            acc = part if acc is None else acc + part
    y = acc * s_ref[...] + b_ref[...]
    if relu:
        y = jnp.maximum(y, 0.0)
    o_ref[0, 0] = y.astype(o_ref.dtype)


def _dw3s1_kernel(x0_ref, x1_ref, x2_ref, w_ref, s_ref, b_ref, o_ref, *, wo, relu):
    """Direct depthwise 3x3 stride-1 conv for one output row (VPU, f32 compute)."""
    rows = (x0_ref[0, 0].astype(jnp.float32),
            x1_ref[0, 0].astype(jnp.float32),
            x2_ref[0, 0].astype(jnp.float32))
    acc = None
    for dy in range(3):
        for dx in range(3):
            part = rows[dy][dx:dx + wo, :] * w_ref[dy * 3 + dx]
            acc = part if acc is None else acc + part
    y = acc * s_ref[...] + b_ref[...]
    if relu:
        y = jnp.maximum(y, 0.0)
    o_ref[0, 0] = y.astype(o_ref.dtype)


def _dw_kernel(p_ref, w_ref, s_ref, b_ref, o_ref, *, taps, act):
    """Tap-stacked depthwise conv (stride-2 path).  p: (taps,TM,CL) bf16."""
    acc = p_ref[0].astype(jnp.float32) * w_ref[0]
    for t in range(1, taps):
        acc = acc + p_ref[t].astype(jnp.float32) * w_ref[t]
    y = acc * s_ref[...] + b_ref[...]
    if act == "relu":
        y = jnp.maximum(y, 0.0)
    o_ref[...] = y.astype(o_ref.dtype)


def _pool_kernel(p_ref, o_ref, *, taps, mode):
    acc = p_ref[0].astype(jnp.float32)
    for t in range(1, taps):
        v = p_ref[t].astype(jnp.float32)
        acc = jnp.maximum(acc, v) if mode == "max" else acc + v
    if mode == "avg":
        acc = acc * (1.0 / taps)            # count_include_pad=True (torch default)
    o_ref[...] = acc.astype(o_ref.dtype)


def _gap_kernel(x_ref, o_ref, acc_ref, *, inv_count):
    @pl.when(pl.program_id(0) == 0)
    def _init():
        acc_ref[...] = jnp.zeros_like(acc_ref)

    acc_ref[...] += jnp.sum(x_ref[...].astype(jnp.float32), axis=1, keepdims=True)

    @pl.when(pl.program_id(0) == pl.num_programs(0) - 1)
    def _fin():
        o_ref[...] = (acc_ref[...] * inv_count).astype(o_ref.dtype)


def _upsample_kernel(rlo_ref, rhi_ref, rfr_ref, x0_ref, x1_ref, cm_ref, o_ref, *, act):
    """Bilinear (align_corners=True) upsample of one output row:
    2-tap row lerp (rows picked by scalar prefetch) + (Wo,W)@(W,C) column interp."""
    ho = pl.program_id(1)
    fr = rfr_ref[ho].astype(jnp.float32) * (1.0 / 65536.0)
    r0 = x0_ref[0, 0].astype(jnp.float32)
    r1 = x1_ref[0, 0].astype(jnp.float32)
    row = r0 + fr * (r1 - r0)
    out = jnp.dot(cm_ref[...], row, preferred_element_type=jnp.float32)
    if act == "sigmoid":
        out = jax.nn.sigmoid(out)
    o_ref[0, 0] = out.astype(o_ref.dtype)


# ----------------------------- matmul wrapper --------------------------------

def matmul_bn_act(x, w, scale=None, bias=None, *, act=None, residual=None,
                  epilogue=None, out_dtype=_BF16):
    """out = epilogue(act(x @ w * scale + bias), residual).  x:(M,K)  w:(K,Nc)."""
    M, K = x.shape
    Nc = w.shape[1]
    has_bn = scale is not None

    TM = min(512, _round_up(M, 8))
    TN = _pick_tile128(Nc, 256)
    TK = _pick_tile128(K, _TK_CAP)
    Mp, Kp, Np = _round_up(M, TM), _round_up(K, TK), _round_up(Nc, TN)

    xb = jnp.pad(x.astype(_BF16), ((0, Mp - M), (0, Kp - K)))
    wb = jnp.pad(w.astype(_BF16), ((0, Kp - K), (0, Np - Nc)))
    args = [xb, wb]
    in_specs = [pl.BlockSpec((TM, TK), lambda i, j, k: (i, k)),
                pl.BlockSpec((TK, TN), lambda i, j, k: (k, j))]
    if has_bn:
        sb = jnp.pad(scale.astype(jnp.float32).reshape(1, Nc), ((0, 0), (0, Np - Nc)))
        bb = jnp.pad(bias.astype(jnp.float32).reshape(1, Nc), ((0, 0), (0, Np - Nc)))
        args += [sb, bb]
        in_specs += [pl.BlockSpec((1, TN), lambda i, j, k: (0, j)),
                     pl.BlockSpec((1, TN), lambda i, j, k: (0, j))]
    if epilogue is not None:
        rb = jnp.pad(residual.reshape(M, Nc).astype(_BF16),
                     ((0, Mp - M), (0, Np - Nc)))
        args.append(rb)
        in_specs.append(pl.BlockSpec((TM, TN), lambda i, j, k: (i, j)))

    nk = Kp // TK
    grid = (Mp // TM, Np // TN, nk)
    out_bytes = jnp.dtype(out_dtype).itemsize
    cost = pl.CostEstimate(flops=2 * Mp * Kp * Np, transcendentals=0,
                           bytes_accessed=(Mp * Kp + Kp * Np) * 2 + Mp * Np * out_bytes)

    out = pl.pallas_call(
        partial(_mm_kernel, nk=nk, act=act, epilogue=epilogue, has_bn=has_bn),
        grid=grid,
        in_specs=in_specs,
        out_specs=pl.BlockSpec((TM, TN), lambda i, j, k: (i, j)),
        out_shape=jax.ShapeDtypeStruct((Mp, Np), out_dtype),
        scratch_shapes=[pltpu.VMEM((TM, TN), jnp.float32)],
        compiler_params=pltpu.CompilerParams(
            dimension_semantics=("parallel", "parallel", "arbitrary"),
            vmem_limit_bytes=_VMEM_LIMIT),
        cost_estimate=cost,
    )(*args)
    return out[:M, :Nc]


# ----------------------------- conv wrappers ----------------------------------

def conv3x3s1_bn_act(x, w9, scale, bias, *, act=None):
    """Dense 3x3 stride-1 pad-1 conv + folded BN + optional relu (direct kernel)."""
    N, H, W, C = x.shape
    cout = w9.shape[-1]
    xp = jnp.pad(x, ((0, 0), (1, 1), (1, 1), (0, 0)))
    Wp = W + 2

    def row_spec(d):
        return pl.BlockSpec((1, 1, Wp, C), lambda n, h, d=d: (n, h + d, 0, 0))

    cost = pl.CostEstimate(
        flops=2 * N * H * W * 9 * C * cout, transcendentals=0,
        bytes_accessed=3 * N * (H + 2) * Wp * C * 2 + 9 * C * cout * 2
        + N * H * W * cout * 2)
    return pl.pallas_call(
        partial(_conv3s1_kernel, wo=W, relu=(act == "relu")),
        grid=(N, H),
        in_specs=[row_spec(0), row_spec(1), row_spec(2),
                  pl.BlockSpec((9, C, cout), lambda n, h: (0, 0, 0)),
                  pl.BlockSpec((1, cout), lambda n, h: (0, 0)),
                  pl.BlockSpec((1, cout), lambda n, h: (0, 0))],
        out_specs=pl.BlockSpec((1, 1, W, cout), lambda n, h: (n, h, 0, 0)),
        out_shape=jax.ShapeDtypeStruct((N, H, W, cout), _BF16),
        compiler_params=pltpu.CompilerParams(
            dimension_semantics=("parallel", "parallel"),
            vmem_limit_bytes=_VMEM_LIMIT),
        cost_estimate=cost,
    )(xp, xp, xp, w9,
      scale.astype(jnp.float32).reshape(1, cout),
      bias.astype(jnp.float32).reshape(1, cout))


def dwconv3x3s1(x, w9, scale, bias, *, act=None):
    """Depthwise 3x3 stride-1 pad-1 conv + folded BN + optional relu (direct)."""
    N, H, W, C = x.shape
    xp = jnp.pad(x, ((0, 0), (1, 1), (1, 1), (0, 0)))
    Wp = W + 2

    def row_spec(d):
        return pl.BlockSpec((1, 1, Wp, C), lambda n, h, d=d: (n, h + d, 0, 0))

    return pl.pallas_call(
        partial(_dw3s1_kernel, wo=W, relu=(act == "relu")),
        grid=(N, H),
        in_specs=[row_spec(0), row_spec(1), row_spec(2),
                  pl.BlockSpec((9, 1, C), lambda n, h: (0, 0, 0)),
                  pl.BlockSpec((1, C), lambda n, h: (0, 0)),
                  pl.BlockSpec((1, C), lambda n, h: (0, 0))],
        out_specs=pl.BlockSpec((1, 1, W, C), lambda n, h: (n, h, 0, 0)),
        out_shape=jax.ShapeDtypeStruct((N, H, W, C), _BF16),
        compiler_params=pltpu.CompilerParams(
            dimension_semantics=("parallel", "parallel"),
            vmem_limit_bytes=_VMEM_LIMIT),
    )(xp, xp, xp,
      w9.astype(jnp.float32).reshape(9, 1, C),
      scale.astype(jnp.float32).reshape(1, C),
      bias.astype(jnp.float32).reshape(1, C))


def conv1x1(x, w, scale=None, bias=None, *, act=None, residual=None, epilogue=None):
    N, H, W, cin = x.shape
    cout = w.shape[1]
    res = None if residual is None else residual.reshape(N * H * W, cout)
    out = matmul_bn_act(x.reshape(N * H * W, cin), w, scale, bias,
                        act=act, residual=res, epilogue=epilogue)
    return out.reshape(N, H, W, cout)


def _im2col(x, kh, kw, stride, pad, pad_value=0.0):
    """Return list of (N,Ho,Wo,C) shifted views + output spatial dims."""
    N, H, W, C = x.shape
    if pad > 0:
        x = jnp.pad(x, ((0, 0), (pad, pad), (pad, pad), (0, 0)),
                    constant_values=pad_value)
    Ho = (H + 2 * pad - kh) // stride + 1
    Wo = (W + 2 * pad - kw) // stride + 1
    cols = []
    for dy in range(kh):
        for dx in range(kw):
            cols.append(x[:, dy:dy + stride * (Ho - 1) + 1:stride,
                          dx:dx + stride * (Wo - 1) + 1:stride, :])
    return cols, Ho, Wo


def conv_im2col(x, w2d, scale, bias, *, ks, stride, pad, act=None):
    """Strided dense conv via im2col + fused matmul (stride-2 layers only).
    TODO(synk): stride-2 dense convs still materialize an im2col patch matrix."""
    N = x.shape[0]
    cin = x.shape[-1]
    cols, Ho, Wo = _im2col(x, ks, ks, stride, pad)
    patches = jnp.concatenate(cols, axis=-1).reshape(N * Ho * Wo, ks * ks * cin)
    out = matmul_bn_act(patches, w2d, scale, bias, act=act)
    return out.reshape(N, Ho, Wo, w2d.shape[1])


def dwconv_tap_stack(x, w9, scale, bias, *, stride, pad, act=None):
    """Depthwise conv via tap-stacked patches (stride-2 path), lane-densified
    for small C.  TODO(synk): still materializes a taps-stacked HBM buffer."""
    N, H, W, C = x.shape
    taps = 9
    cols, Ho, Wo = _im2col(x, 3, 3, stride, pad)
    M = N * Ho * Wo
    patches = jnp.stack(cols, axis=0).reshape(taps, M, C).astype(_BF16)
    w = w9.astype(jnp.float32)
    s = scale.astype(jnp.float32)
    b = bias.astype(jnp.float32)
    folded = C < 128 and (128 % C == 0)
    if folded:
        g = 128 // C
        Mg = _round_up(M, g)
        patches = jnp.pad(patches, ((0, 0), (0, Mg - M), (0, 0)))
        patches = patches.reshape(taps, Mg // g, 128)
        w = jnp.tile(w, (1, g))
        s = jnp.tile(s, g)
        b = jnp.tile(b, g)
        rows, CL = Mg // g, 128
    else:
        rows, CL = M, C
    TM = min(512, _round_up(rows, 8))
    Mp = _round_up(rows, TM)
    patches = jnp.pad(patches, ((0, 0), (0, Mp - rows), (0, 0)))
    out = pl.pallas_call(
        partial(_dw_kernel, taps=taps, act=act),
        grid=(Mp // TM,),
        in_specs=[pl.BlockSpec((taps, TM, CL), lambda i: (0, i, 0)),
                  pl.BlockSpec((taps, 1, CL), lambda i: (0, 0, 0)),
                  pl.BlockSpec((1, CL), lambda i: (0, 0)),
                  pl.BlockSpec((1, CL), lambda i: (0, 0))],
        out_specs=pl.BlockSpec((TM, CL), lambda i: (i, 0)),
        out_shape=jax.ShapeDtypeStruct((Mp, CL), _BF16),
        compiler_params=pltpu.CompilerParams(
            dimension_semantics=("parallel",), vmem_limit_bytes=_VMEM_LIMIT),
    )(patches, w.reshape(taps, 1, CL), s.reshape(1, CL), b.reshape(1, CL))
    out = out[:rows]
    if folded:
        out = out.reshape(rows * (128 // C), C)
    return out[:M].reshape(N, Ho, Wo, C)


def pool2d(x, *, kind, ksize=3, stride=2, pad=1):
    """Max/avg pool via tap-stacked patches, lane-densified for small C.
    TODO(synk): still materializes a taps-stacked HBM buffer."""
    N, H, W, C = x.shape
    taps = ksize * ksize
    pv = -1e30 if kind == "max" else 0.0
    cols, Ho, Wo = _im2col(x, ksize, ksize, stride, pad, pad_value=pv)
    M = N * Ho * Wo
    patches = jnp.stack(cols, axis=0).reshape(taps, M, C).astype(_BF16)
    folded = C < 128 and (128 % C == 0)
    if folded:
        g = 128 // C
        Mg = _round_up(M, g)
        patches = jnp.pad(patches, ((0, 0), (0, Mg - M), (0, 0)))
        patches = patches.reshape(taps, Mg // g, 128)
        rows, CL = Mg // g, 128
    else:
        rows, CL = M, C
    TM = min(512, _round_up(rows, 8))
    Mp = _round_up(rows, TM)
    patches = jnp.pad(patches, ((0, 0), (0, Mp - rows), (0, 0)))
    out = pl.pallas_call(
        partial(_pool_kernel, taps=taps, mode=kind),
        grid=(Mp // TM,),
        in_specs=[pl.BlockSpec((taps, TM, CL), lambda i: (0, i, 0))],
        out_specs=pl.BlockSpec((TM, CL), lambda i: (i, 0)),
        out_shape=jax.ShapeDtypeStruct((Mp, CL), _BF16),
        compiler_params=pltpu.CompilerParams(
            dimension_semantics=("parallel",), vmem_limit_bytes=_VMEM_LIMIT),
    )(patches)
    out = out[:rows]
    if folded:
        out = out.reshape(rows * (128 // C), C)
    return out[:M].reshape(N, Ho, Wo, C)


def global_avg_pool(x):
    N, H, W, C = x.shape
    HW = H * W
    xf = x.reshape(N, HW, C)
    THW = min(512, _round_up(HW, 8))
    HWp = _round_up(HW, THW)
    xf = jnp.pad(xf, ((0, 0), (0, HWp - HW), (0, 0)))
    out = pl.pallas_call(
        partial(_gap_kernel, inv_count=1.0 / HW),
        grid=(HWp // THW,),
        in_specs=[pl.BlockSpec((N, THW, C), lambda i: (0, i, 0))],
        out_specs=pl.BlockSpec((N, 1, C), lambda i: (0, 0, 0)),
        out_shape=jax.ShapeDtypeStruct((N, 1, C), _BF16),
        scratch_shapes=[pltpu.VMEM((N, 1, C), jnp.float32)],
        compiler_params=pltpu.CompilerParams(
            dimension_semantics=("arbitrary",), vmem_limit_bytes=_VMEM_LIMIT),
    )(xf)
    return out.reshape(N, 1, 1, C)


# ----------------------------- bilinear upsample ------------------------------

def _bilinear_matrix(n_in, n_out):
    """align_corners=True 1-D interpolation matrix (n_out, n_in)."""
    m = np.zeros((n_out, n_in), dtype=np.float32)
    if n_in == 1:
        m[:, 0] = 1.0
        return m
    scale = (n_in - 1) / (n_out - 1)
    for o in range(n_out):
        src = o * scale
        i0 = min(int(np.floor(src)), n_in - 1)
        i1 = min(i0 + 1, n_in - 1)
        f = min(max(src - i0, 0.0), 1.0)
        m[o, i0] += 1.0 - f
        m[o, i1] += f
    return m


def upsample_bilinear(x, factor, *, act=None, out_dtype=_BF16):
    """Bilinear upsample (align_corners=True) in NHWC: 2-tap row lerp with
    scalar-prefetch row indices + column-interp matmul, optional fused sigmoid."""
    N, H, W, C = x.shape
    Ho, Wo = H * factor, W * factor
    if H == 1:
        rlo = np.zeros((Ho,), np.int32)
        rhi = np.zeros((Ho,), np.int32)
        rfr = np.zeros((Ho,), np.int32)
    else:
        src = np.arange(Ho, dtype=np.float64) * (H - 1) / (Ho - 1)
        lo = np.minimum(np.floor(src).astype(np.int32), H - 1)
        hi = np.minimum(lo + 1, H - 1)
        fr = np.clip(src - lo, 0.0, 1.0)
        rlo, rhi = lo, hi
        rfr = np.round(fr * 65536.0).astype(np.int32)
    cm = _bilinear_matrix(W, Wo)                                   # (Wo, W)

    grid_spec = pltpu.PrefetchScalarGridSpec(
        num_scalar_prefetch=3,
        grid=(N, Ho),
        in_specs=[
            pl.BlockSpec((1, 1, W, C), lambda n, h, rlo, rhi, rfr: (n, rlo[h], 0, 0)),
            pl.BlockSpec((1, 1, W, C), lambda n, h, rlo, rhi, rfr: (n, rhi[h], 0, 0)),
            pl.BlockSpec((Wo, W), lambda n, h, rlo, rhi, rfr: (0, 0)),
        ],
        out_specs=pl.BlockSpec((1, 1, Wo, C), lambda n, h, rlo, rhi, rfr: (n, h, 0, 0)),
    )
    return pl.pallas_call(
        partial(_upsample_kernel, act=act),
        grid_spec=grid_spec,
        out_shape=jax.ShapeDtypeStruct((N, Ho, Wo, C), out_dtype),
        compiler_params=pltpu.CompilerParams(
            dimension_semantics=("parallel", "arbitrary"),
            vmem_limit_bytes=_VMEM_LIMIT),
    )(jnp.asarray(rlo), jnp.asarray(rhi), jnp.asarray(rfr),
      x, x, jnp.asarray(cm))


# ----------------------------- parameter init --------------------------------

class ParamGen:
    def __init__(self, key):
        self._key = key

    def _k(self):
        self._key, k = jax.random.split(self._key)
        return k

    def conv(self, kh, kw, cin, cout):
        fan = kh * kw * cin
        return jax.random.normal(self._k(), (kh, kw, cin, cout), jnp.float32) / math.sqrt(fan)

    def dwconv(self, kh, kw, c):
        return jax.random.normal(self._k(), (kh, kw, c), jnp.float32) / math.sqrt(kh * kw)

    def bn(self, c):
        s = 1.0 + 0.1 * jax.random.normal(self._k(), (c,), jnp.float32)
        b = 0.1 * jax.random.normal(self._k(), (c,), jnp.float32)
        return s, b

    def bias(self, c):
        return 0.1 * jax.random.normal(self._k(), (c,), jnp.float32)


# ----------------------------- modules ---------------------------------------

def init_convbnlu(pg, cin, cout, ks=3, stride=1, pad=1):
    w = pg.conv(ks, ks, cin, cout)
    s, b = pg.bn(cout)
    if ks == 3 and stride == 1 and pad == 1:
        return dict(kind="c3s1", w=w.reshape(9, cin, cout).astype(_BF16), s=s, b=b)
    if ks == 1:
        return dict(kind="c1", w=w.reshape(cin, cout).astype(_BF16), s=s, b=b)
    return dict(kind="im2col", w=w.reshape(ks * ks * cin, cout).astype(_BF16),
                s=s, b=b, ks=ks, stride=stride, pad=pad)


def fwd_convbnlu(p, x):
    if p["kind"] == "c3s1":
        return conv3x3s1_bn_act(x, p["w"], p["s"], p["b"], act="relu")
    if p["kind"] == "c1":
        return conv1x1(x, p["w"], p["s"], p["b"], act="relu")
    return conv_im2col(x, p["w"], p["s"], p["b"], ks=p["ks"], stride=p["stride"],
                       pad=p["pad"], act="relu")


def init_detail(pg):
    return dict(
        S1=[init_convbnlu(pg, 3, 64, 3, 2), init_convbnlu(pg, 64, 64, 3, 1)],
        S2=[init_convbnlu(pg, 64, 64, 3, 2), init_convbnlu(pg, 64, 64, 3, 1),
            init_convbnlu(pg, 64, 64, 3, 1)],
        S3=[init_convbnlu(pg, 64, 128, 3, 2), init_convbnlu(pg, 128, 128, 3, 1),
            init_convbnlu(pg, 128, 128, 3, 1)],
    )


def fwd_detail(p, x):
    for blk in ("S1", "S2", "S3"):
        for lp in p[blk]:
            x = fwd_convbnlu(lp, x)
    return x


def init_stem(pg):
    return dict(
        conv=init_convbnlu(pg, 3, 16, 3, 2),
        left0=init_convbnlu(pg, 16, 8, 1, 1, 0),
        left1=init_convbnlu(pg, 8, 16, 3, 2, 1),
        fuse=init_convbnlu(pg, 32, 16, 3, 1),
    )


def fwd_stem(p, x):
    x = fwd_convbnlu(p["conv"], x)
    xl = fwd_convbnlu(p["left0"], x)
    xl = fwd_convbnlu(p["left1"], xl)
    xr = pool2d(x, kind="max", ksize=3, stride=2, pad=1)
    x = jnp.concatenate([xl, xr], axis=-1)       # torch cat on channel dim
    return fwd_convbnlu(p["fuse"], x)


def init_ge_s1(pg, cin, cout, exp=6):
    mid = cin * exp
    dw_s, dw_b = pg.bn(mid)
    c2_s, c2_b = pg.bn(cout)
    return dict(conv1=init_convbnlu(pg, cin, mid, 3, 1),
                dw_w=pg.dwconv(3, 3, mid).reshape(9, mid), dw_s=dw_s, dw_b=dw_b,
                c2_w=pg.conv(1, 1, mid, cout).reshape(mid, cout).astype(_BF16),
                c2_s=c2_s, c2_b=c2_b)


def fwd_ge_s1(p, x):
    x1 = fwd_convbnlu(p["conv1"], x)
    x1 = dwconv3x3s1(x1, p["dw_w"], p["dw_s"], p["dw_b"], act="relu")
    # 1x1 projection + BN with fused residual add + relu
    return conv1x1(x1, p["c2_w"], p["c2_s"], p["c2_b"], act=None,
                   residual=x, epilogue="add_relu")


def init_ge_s2(pg, cin, cout, exp=6):
    mid = cin * exp
    dw1_s, dw1_b = pg.bn(mid)
    dw2_s, dw2_b = pg.bn(mid)
    c2_s, c2_b = pg.bn(cout)
    sdw_s, sdw_b = pg.bn(cin)
    sc_s, sc_b = pg.bn(cout)
    return dict(conv1=init_convbnlu(pg, cin, mid, 3, 1),
                dw1_w=pg.dwconv(3, 3, mid).reshape(9, mid), dw1_s=dw1_s, dw1_b=dw1_b,
                dw2_w=pg.dwconv(3, 3, mid).reshape(9, mid), dw2_s=dw2_s, dw2_b=dw2_b,
                c2_w=pg.conv(1, 1, mid, cout).reshape(mid, cout).astype(_BF16),
                c2_s=c2_s, c2_b=c2_b,
                sc_dw_w=pg.dwconv(3, 3, cin).reshape(9, cin), sc_dw_s=sdw_s, sc_dw_b=sdw_b,
                sc_c_w=pg.conv(1, 1, cin, cout).reshape(cin, cout).astype(_BF16),
                sc_c_s=sc_s, sc_c_b=sc_b)


def fwd_ge_s2(p, x):
    x1 = fwd_convbnlu(p["conv1"], x)
    x1 = dwconv_tap_stack(x1, p["dw1_w"], p["dw1_s"], p["dw1_b"], stride=2, pad=1, act=None)
    x1 = dwconv3x3s1(x1, p["dw2_w"], p["dw2_s"], p["dw2_b"], act="relu")
    x1 = conv1x1(x1, p["c2_w"], p["c2_s"], p["c2_b"], act=None)
    x2 = dwconv_tap_stack(x, p["sc_dw_w"], p["sc_dw_s"], p["sc_dw_b"], stride=2, pad=1, act=None)
    # shortcut 1x1 + BN with fused residual add + relu against the main path
    return conv1x1(x2, p["sc_c_w"], p["sc_c_s"], p["sc_c_b"], act=None,
                   residual=x1, epilogue="add_relu")


def init_ce(pg):
    bn_s, bn_b = pg.bn(128)
    gap_w = pg.conv(1, 1, 128, 128).reshape(128, 128)
    gap_s, gap_b = pg.bn(128)
    # Fold the standalone BN (before conv_gap) into the 1x1 weights, at init time:
    #   ((x*bn_s + bn_b) @ W) * gap_s + gap_b
    # = (x @ (bn_s[:,None]*W)) * gap_s + ((bn_b @ W) * gap_s + gap_b)
    w_fold = (bn_s[:, None] * gap_w).astype(_BF16)
    b_fold = (bn_b @ gap_w) * gap_s + gap_b
    return dict(gap_wf=w_fold, gap_s=gap_s, gap_bf=b_fold,
                conv_last=init_convbnlu(pg, 128, 128, 3, 1))


def fwd_ce(p, x):
    x1 = global_avg_pool(x)                                   # (N,1,1,128)
    x1 = conv1x1(x1, p["gap_wf"], p["gap_s"], p["gap_bf"], act="relu")
    x = x + x1.astype(x.dtype)                                # broadcast add (XLA glue)
    return fwd_convbnlu(p["conv_last"], x)


def init_segment(pg):
    return dict(
        stem=init_stem(pg),
        S3=[init_ge_s2(pg, 16, 32), init_ge_s1(pg, 32, 32)],
        S4=[init_ge_s2(pg, 32, 64), init_ge_s1(pg, 64, 64)],
        S5_4=[init_ge_s2(pg, 64, 128), init_ge_s1(pg, 128, 128),
              init_ge_s1(pg, 128, 128), init_ge_s1(pg, 128, 128)],
        S5_5=init_ce(pg),
    )


def fwd_segment(p, x):
    x2 = fwd_stem(p["stem"], x)
    x3 = fwd_ge_s1(p["S3"][1], fwd_ge_s2(p["S3"][0], x2))
    x4 = fwd_ge_s1(p["S4"][1], fwd_ge_s2(p["S4"][0], x3))
    x5 = fwd_ge_s2(p["S5_4"][0], x4)
    for lp in p["S5_4"][1:]:
        x5 = fwd_ge_s1(lp, x5)
    x5_5 = fwd_ce(p["S5_5"], x5)
    return x2, x3, x4, x5, x5_5


def init_bga(pg):
    l1_s, l1_b = pg.bn(128)
    l2_s, l2_b = pg.bn(128)
    r1_s, r1_b = pg.bn(128)
    r2_s, r2_b = pg.bn(128)
    c_s, c_b = pg.bn(128)
    return dict(
        l1_dw_w=pg.dwconv(3, 3, 128).reshape(9, 128), l1_dw_s=l1_s, l1_dw_b=l1_b,
        l1_pw_w=pg.conv(1, 1, 128, 128).reshape(128, 128).astype(_BF16),
        l2_w=pg.conv(3, 3, 128, 128).reshape(9 * 128, 128).astype(_BF16),
        l2_s=l2_s, l2_b=l2_b,
        r1_w=pg.conv(3, 3, 128, 128).reshape(9, 128, 128).astype(_BF16),
        r1_s=r1_s, r1_b=r1_b,
        r2_dw_w=pg.dwconv(3, 3, 128).reshape(9, 128), r2_dw_s=r2_s, r2_dw_b=r2_b,
        r2_pw_w=pg.conv(1, 1, 128, 128).reshape(128, 128).astype(_BF16),
        conv_w=pg.conv(3, 3, 128, 128).reshape(9, 128, 128).astype(_BF16),
        conv_s=c_s, conv_b=c_b,
    )


def fwd_bga(p, x_d, x_s):
    # right_1: 3x3 conv + BN -> bilinear x4 upsample with FUSED sigmoid
    right1 = conv3x3s1_bn_act(x_s, p["r1_w"], p["r1_s"], p["r1_b"], act=None)
    right1 = upsample_bilinear(right1, 4, act="sigmoid")
    # left_1: dw 3x3 + BN, then 1x1 conv with FUSED "* right1" gating epilogue
    left1 = dwconv3x3s1(x_d, p["l1_dw_w"], p["l1_dw_s"], p["l1_dw_b"], act=None)
    x_left = conv1x1(left1, p["l1_pw_w"], act=None, residual=right1, epilogue="mul")
    # left_2: 3x3 s2 conv + BN, then 3x3 s2 avg pool
    left2 = conv_im2col(x_d, p["l2_w"], p["l2_s"], p["l2_b"], ks=3, stride=2, pad=1, act=None)
    left2 = pool2d(left2, kind="avg", ksize=3, stride=2, pad=1)
    # right_2: dw 3x3 + BN, 1x1 conv + sigmoid with FUSED "* left2" gating
    right2 = dwconv3x3s1(x_s, p["r2_dw_w"], p["r2_dw_s"], p["r2_dw_b"], act=None)
    x_right = conv1x1(right2, p["r2_pw_w"], act="sigmoid", residual=left2, epilogue="mul")
    x_right = upsample_bilinear(x_right, 4)
    x = x_left + x_right          # fused by XLA into the next conv's padding glue
    return conv3x3s1_bn_act(x, p["conv_w"], p["conv_s"], p["conv_b"], act=None)


def init_head(pg, cin, mid, n_class, up):
    return dict(conv=init_convbnlu(pg, cin, mid, 3, 1),
                out_w=pg.conv(1, 1, mid, n_class).reshape(mid, n_class).astype(_BF16),
                out_s=jnp.ones((n_class,), jnp.float32),
                out_b=pg.bias(n_class),
                up=up)


def fwd_head(p, x):
    x = fwd_convbnlu(p["conv"], x)
    # TODO(synk): nn.Dropout(0.1) is stochastic in train mode; identity here.
    # Classifier emits n_class channels directly (low-res, bf16) before upsample.
    x = conv1x1(x, p["out_w"], p["out_s"], p["out_b"], act=None)
    return upsample_bilinear(x, p["up"])


def init_bisenetv2(key, n_class):
    pg = ParamGen(key)
    return dict(
        detail=init_detail(pg),
        segment=init_segment(pg),
        bga=init_bga(pg),
        head=init_head(pg, 128, 64, n_class, 8),
        aux2=init_head(pg, 16, 128, n_class, 4),
        aux3=init_head(pg, 32, 128, n_class, 8),
        aux4=init_head(pg, 64, 128, n_class, 16),
        aux5_4=init_head(pg, 128, 128, n_class, 32),
    )


def bisenetv2_forward(params, x_nchw):
    """mode='train' forward: returns (logit, aux2, aux3, aux4, aux5_4) in NCHW."""
    x = jnp.transpose(x_nchw, (0, 2, 3, 1)).astype(_BF16)      # NCHW -> NHWC bf16
    x_d = fwd_detail(params["detail"], x)
    x2, x3, x4, x5_4, x_s = fwd_segment(params["segment"], x)
    xf = fwd_bga(params["bga"], x_d, x_s)
    logit = fwd_head(params["head"], xf)
    logit_aux2 = fwd_head(params["aux2"], x2)
    logit_aux3 = fwd_head(params["aux3"], x3)
    logit_aux4 = fwd_head(params["aux4"], x4)
    logit_aux5_4 = fwd_head(params["aux5_4"], x5_4)
    outs = (logit, logit_aux2, logit_aux3, logit_aux4, logit_aux5_4)
    return tuple(jnp.transpose(o, (0, 3, 1, 2)).astype(jnp.float32) for o in outs)


# ----------------------------- main -------------------------------------------

if __name__ == "__main__":
    key = jax.random.PRNGKey(0)
    pkey, xkey = jax.random.split(key)
    n_class = 4
    params = init_bisenetv2(pkey, n_class)
    # torch-style NCHW input; spatial must be divisible by 32 (segment /32 path)
    x = jax.random.normal(xkey, (2, 3, 32, 32), jnp.float32)
    outs = bisenetv2_forward(params, x)
    outs = jax.block_until_ready(outs)
    assert all(o.shape == (2, n_class, 32, 32) for o in outs)
    assert all(bool(jnp.all(jnp.isfinite(o))) for o in outs)
    print("KERNEL_OK")
</pallas_src>

<mosaic_0001>
module attributes {stable_mosaic.version = 11 : i64} {
  func.func @_mm_kernel(%arg0: i32, %arg1: i32, %arg2: i32, %arg3: memref<512x128xbf16, #tpu.memory_space<vmem>>, %arg4: memref<128x128xbf16, #tpu.memory_space<vmem>>, %arg5: memref<1x128xf32, #tpu.memory_space<vmem>>, %arg6: memref<1x128xf32, #tpu.memory_space<vmem>>, %arg7: memref<512x128xbf16, #tpu.memory_space<vmem>>, %arg8: memref<512x128xf32, #tpu.memory_space<vmem>>) attributes {dimension_semantics = [#tpu.dimension_semantics<parallel>, #tpu.dimension_semantics<parallel>, #tpu.dimension_semantics<arbitrary>], iteration_bounds = array<i64: 1, 1, 1>, scalar_prefetch = 0 : i64, scratch_operands = 1 : i64, tpu.core_type = #tpu.core_type<tc>, window_params = [{transform_indices = @transform_0, window_bounds = array<i64: 512, 128>}, {transform_indices = @transform_1, window_bounds = array<i64: 128, 128>}, {transform_indices = @transform_2, window_bounds = array<i64: 1, 128>}, {transform_indices = @transform_3, window_bounds = array<i64: 1, 128>}, {transform_indices = @transform_4, window_bounds = array<i64: 512, 128>}]} {
    %c0_i32 = arith.constant 0 : i32
    %0 = arith.cmpi eq, %arg2, %c0_i32 : i32
    %1 = arith.extui %0 : i1 to i32
    %c0_i32_0 = arith.constant 0 : i32
    %2 = arith.cmpi ne, %1, %c0_i32_0 : i32
    scf.if %2 {
      %cst_10 = arith.constant 0.000000e+00 : f32
      %12 = vector.broadcast %cst_10 : f32 to vector<512x128xf32>
      %c0_11 = arith.constant 0 : index
      %c0_12 = arith.constant 0 : index
      %13 = vector.load %arg8[%c0_11, %c0_12] : memref<512x128xf32, #tpu.memory_space<vmem>>, vector<512x128xf32>
      tpu.vector_store %arg8[%c0_11, %c0_12], %12 {strides = array<i32>} : memref<512x128xf32, #tpu.memory_space<vmem>>, vector<512x128xf32>,
    } else {
    }
    %c0 = arith.constant 0 : index
    %c0_1 = arith.constant 0 : index
    %3 = vector.load %arg8[%c0, %c0_1] : memref<512x128xf32, #tpu.memory_space<vmem>>, vector<512x128xf32>
    %c0_2 = arith.constant 0 : index
    %c0_3 = arith.constant 0 : index
    %4 = vector.load %arg3[%c0_2, %c0_3] : memref<512x128xbf16, #tpu.memory_space<vmem>>, vector<512x128xbf16>
    %c0_4 = arith.constant 0 : index
    %c0_5 = arith.constant 0 : index
    %5 = vector.load %arg4[%c0_4, %c0_5] : memref<128x128xbf16, #tpu.memory_space<vmem>>, vector<128x128xbf16>
    %cst = arith.constant dense<0.000000e+00> : vector<512x128xf32>
    %6 = tpu.matmul %4, %5, %cst {dimension_numbers = #tpu.dot_dimension_numbers<[1], [0], [0], [1], [0, 0, 1, 1], [], []>} : vector<512x128xbf16>, vector<128x128xbf16>, vector<512x128xf32> -> vector<512x128xf32>
    %7 = arith.addf %3, %6 : vector<512x128xf32>
    %c0_6 = arith.constant 0 : index
    %c0_7 = arith.constant 0 : index
    %8 = vector.load %arg8[%c0_6, %c0_7] : memref<512x128xf32, #tpu.memory_space<vmem>>, vector<512x128xf32>
    tpu.vector_store %arg8[%c0_6, %c0_7], %7 {strides = array<i32>} : memref<512x128xf32, #tpu.memory_space<vmem>>, vector<512x128xf32>,
    %c0_i32_8 = arith.constant 0 : i32
    %9 = arith.cmpi eq, %arg2, %c0_i32_8 : i32
    %10 = arith.extui %9 : i1 to i32
    %c0_i32_9 = arith.constant 0 : i32
    %11 = arith.cmpi ne, %10, %c0_i32_9 : i32
    scf.if %11 {
      %c0_10 = arith.constant 0 : index
      %c0_11 = arith.constant 0 : index
      %12 = vector.load %arg8[%c0_10, %c0_11] : memref<512x128xf32, #tpu.memory_space<vmem>>, vector<512x128xf32>
      %c0_12 = arith.constant 0 : index
      %c0_13 = arith.constant 0 : index
      %13 = vector.load %arg5[%c0_12, %c0_13] : memref<1x128xf32, #tpu.memory_space<vmem>>, vector<1x128xf32>
      %14 = vector.broadcast %13 : vector<1x128xf32> to vector<512x128xf32>
      %15 = arith.mulf %12, %14 : vector<512x128xf32>
      %c0_14 = arith.constant 0 : index
      %c0_15 = arith.constant 0 : index
      %16 = vector.load %arg6[%c0_14, %c0_15] : memref<1x128xf32, #tpu.memory_space<vmem>>, vector<1x128xf32>
      %17 = vector.broadcast %16 : vector<1x128xf32> to vector<512x128xf32>
      %18 = arith.addf %15, %17 : vector<512x128xf32>
      %cst_16 = arith.constant 0.000000e+00 : f32
      %19 = vector.broadcast %cst_16 : f32 to vector<512x128xf32>
      %20 = arith.maximumf %18, %19 : vector<512x128xf32>
      %21 = arith.truncf %20 : vector<512x128xf32> to vector<512x128xbf16>
      %c0_17 = arith.constant 0 : index
      %c0_18 = arith.constant 0 : index
      %22 = vector.load %arg7[%c0_17, %c0_18] : memref<512x128xbf16, #tpu.memory_space<vmem>>, vector<512x128xbf16>
      tpu.vector_store %arg7[%c0_17, %c0_18], %21 {strides = array<i32>} : memref<512x128xbf16, #tpu.memory_space<vmem>>, vector<512x128xbf16>,
    } else {
    }
    return
  }
  func.func @transform_0(%arg0: i32, %arg1: i32, %arg2: i32) -> (i32, i32) {
    %c0_i32 = arith.constant 0 : i32
    return %arg0, %arg2 : i32, i32
  }
  func.func @transform_1(%arg0: i32, %arg1: i32, %arg2: i32) -> (i32, i32) {
    %c0_i32 = arith.constant 0 : i32
    return %arg2, %arg1 : i32, i32
  }
  func.func @transform_2(%arg0: i32, %arg1: i32, %arg2: i32) -> (i32, i32) {
    %c0_i32 = arith.constant 0 : i32
    %c0_i32_0 = arith.constant 0 : i32
    return %c0_i32, %arg1 : i32, i32
  }
  func.func @transform_3(%arg0: i32, %arg1: i32, %arg2: i32) -> (i32, i32) {
    %c0_i32 = arith.constant 0 : i32
    %c0_i32_0 = arith.constant 0 : i32
    return %c0_i32, %arg1 : i32, i32
  }
  func.func @transform_4(%arg0: i32, %arg1: i32, %arg2: i32) -> (i32, i32) {
    %c0_i32 = arith.constant 0 : i32
    return %arg0, %arg1 : i32, i32
  }
}

</mosaic_0001>

<bundles_post_ra>
// kernel: tpu_custom_call.1
= control target key start
LH: loop header
LB: loop body
LE: loop exit
PB: predicated region body
PF: predicated region fallthrough
CT: control target
= control target key end

     0   :  { %9 = vsyncpa [#allocation4], 0  ;;  %s2321_s0 = inlined_call_operand.hbm [shape: bf16[512,128], index: 0, kind: input, shape index: {}]   ;;  %s2322_s1 = inlined_call_operand.hbm [shape: bf16[128,128], index: 1, kind: input, shape index: {}]   ;;  %s2323_s2 = inlined_call_operand.vmem [shape: f32[1,128], index: 2, kind: input, shape index: {}]   ;;  %s2324_s3 = inlined_call_operand.vmem [shape: f32[1,128], index: 3, kind: input, shape index: {}]   ;;  %s2325_s4 = inlined_call_operand.hbm [shape: bf16[512,128], index: 4, kind: output, shape index: {}]  }
   0x1   :  { %10 = vsyncpa [#allocation7], 0 }
   0x2   :  { %11 = vsyncpa [#allocation5], 0  ;;  %s2135_s15 = smov [#allocation3]  }
   0x3   :  { %s17_s16 = sshll.u32 %s2135_s15, 4  ;;  %s18_s16 = int_to_ptr.vmem [resolvable:$true] %s17_s16 }
   0x4   :  { %s2077_s17 = scalar_lea.vmem %s18_s16, 4096  ;;  %p2082_p1 = scmp.lt.s32.totalorder %s18_s16, %s18_s16 }
   0x5   :  { %p2078_p0 = scmp.ne.s32.totalorder %s18_s16, %s2077_s17  ;;  %p2083_p2 = scmp.lt.s32.totalorder %s2077_s17, %s2077_s17 }
   0x7   :  { %p2084_p3 = por %p2083_p2, %p2082_p1 }
   0x9   :  { %p2085_p4 = pnand %p2084_p3, %p2078_p0 }
   0xb   :  { %2088 = shalt.err (!%p2085_p4)
}
   0xc   :  { %s2136_s18 = smov 64   ;;  %s2137_s19 = smov 4  }
   0xd   :  { %23 = dma.hbm_to_vmem [thread:$0]  %s2321_s0, 4096, %s18_s16, [#allocation4], %s2136_s18, %s2136_s18, %s2137_s19  }
   0xe   :  { %s2138_s22 = smov [#allocation6]  }
   0xf   :  { %s29_s23 = sshll.u32 %s2138_s22, 4  ;;  %s30_s23 = int_to_ptr.vmem [resolvable:$true] %s29_s23 }
  0x10   :  { %s2097_s24 = scalar_lea.vmem %s30_s23, 1024  ;;  %p2102_p6 = scmp.lt.s32.totalorder %s30_s23, %s30_s23 }
  0x11   :  { %p2098_p5 = scmp.ne.s32.totalorder %s30_s23, %s2097_s24  ;;  %p2103_p7 = scmp.lt.s32.totalorder %s2097_s24, %s2097_s24 }
  0x13   :  { %p2104_p8 = por %p2103_p7, %p2102_p6 }
  0x15   :  { %p2105_p9 = pnand %p2104_p8, %p2098_p5 }
  0x17   :  { %2108 = shalt.err (!%p2105_p9)
}
  0x18   :  { %35 = dma.hbm_to_vmem [thread:$0]  %s2322_s1, 1024, %s30_s23, [#allocation7], %s2136_s18, %s2136_s18, %s2137_s19  }
  0x19   :  { %2129 = dma.done.wait [#allocation4], 4096  }
  0x1a   :  { %2130 = vsyncadd [#allocation4], 4294963200 }
  0x1b   :  { %2131 = dma.done.wait [#allocation7], 1024  }
  0x1c   :  { %2132 = vsyncadd [#allocation7], 4294966272  ;;  %v2029_v0 = vld [vmem:[#allocation6 + $0x38] sm:$0xff]   ;;  %v2030_v1 = vld [vmem:[#allocation6 + $0x30] sm:$0xff]  }
  0x1d   :  { %1928 = vmatprep.subr.bf16.mxu0 %v2029_v0  ;;  %2008 = vmatprep.subr.bf16.mxu1 %v2029_v0  ;;  %v2031_v2 = vld [vmem:[#allocation6 + $0x28] sm:$0xff]   ;;  %v2032_v3 = vld [vmem:[#allocation6 + $0x20] sm:$0xff]   ;;  %v2033_v6 = vld [vmem:[#allocation6 + $0x18] sm:$0xff]  }
  0x1e   :  { %1929 = vmatpush3.bf16.msra.mxu0 %v2029_v0  ;;  %2016 = vmatpush3.bf16.msra.mxu1 %v2029_v0  ;;  %v2037_v4 = vld [vmem:[#allocation3] sm:$0xff]   ;;  %v2034_v7 = vld [vmem:[#allocation6 + $0x10] sm:$0xff]   ;;  %v2035_v8 = vld [vmem:[#allocation6 + $0x8] sm:$0xff]  }
  0x1f   :  { %1930 = vmatprep.subr.bf16.mxu0 %v2030_v1  ;;  %2009 = vmatprep.subr.bf16.mxu1 %v2030_v1  ;;  %v2038_v5 = vld [vmem:[#allocation3 + $0x80] sm:$0xff]   ;;  %v2039_v10 = vld [vmem:[#allocation3 + $0x8] sm:$0xff]   ;;  %v2041_v12 = vld [vmem:[#allocation3 + $0x10] sm:$0xff]  }
  0x20   :  { %1944 = vmatprep.mubr.bf16.mxu0 %v2037_v4  ;;  %1976 = vmatprep.mubr.bf16.mxu1 %v2038_v5  ;;  %v2036_v9 = vld [vmem:[#allocation6] sm:$0xff]   ;;  %v2040_v11 = vld [vmem:[#allocation3 + $0x88] sm:$0xff]   ;;  %v2042_v13 = vld [vmem:[#allocation3 + $0x90] sm:$0xff]  }
  0x21   :  { %v2043_v14 = vld [vmem:[#allocation3 + $0x18] sm:$0xff]   ;;  %v2045_v16 = vld [vmem:[#allocation3 + $0x20] sm:$0xff]   ;;  %v2047_v18 = vld [vmem:[#allocation3 + $0x28] sm:$0xff]  }
  0x22   :  { %1931 = vmatpush3.bf16.msra.mxu0 %v2030_v1  ;;  %2017 = vmatpush3.bf16.msra.mxu1 %v2030_v1  ;;  %v2044_v15 = vld [vmem:[#allocation3 + $0x98] sm:$0xff]   ;;  %v2046_v17 = vld [vmem:[#allocation3 + $0xa0] sm:$0xff]   ;;  %v2048_v19 = vld [vmem:[#allocation3 + $0xa8] sm:$0xff]  }
  0x23   :  { %1932 = vmatprep.subr.bf16.mxu0 %v2031_v2  ;;  %2010 = vmatprep.subr.bf16.mxu1 %v2031_v2  ;;  %v2049_v20 = vld [vmem:[#allocation3 + $0x30] sm:$0xff]   ;;  %v2051_v22 = vld [vmem:[#allocation3 + $0x38] sm:$0xff]   ;;  %v2053_v24 = vld [vmem:[#allocation3 + $0x40] sm:$0xff]  }
  0x24   :  { %v2050_v21 = vld [vmem:[#allocation3 + $0xb0] sm:$0xff]   ;;  %v2052_v23 = vld [vmem:[#allocation3 + $0xb8] sm:$0xff]   ;;  %v2054_v25 = vld [vmem:[#allocation3 + $0xc0] sm:$0xff]  }
  0x25   :  { %v2055_v26 = vld [vmem:[#allocation3 + $0x48] sm:$0xff]   ;;  %v2057_v28 = vld [vmem:[#allocation3 + $0x50] sm:$0xff]   ;;  %v2059_v30 = vld [vmem:[#allocation3 + $0x58] sm:$0xff]  }
  0x26   :  { %1933 = vmatpush3.bf16.msra.mxu0 %v2031_v2  ;;  %2018 = vmatpush3.bf16.msra.mxu1 %v2031_v2  ;;  %v2056_v27 = vld [vmem:[#allocation3 + $0xc8] sm:$0xff]   ;;  %v2058_v29 = vld [vmem:[#allocation3 + $0xd0] sm:$0xff]   ;;  %v2060_v31 = vld [vmem:[#allocation3 + $0xd8] sm:$0xff]  }
  0x27   :  { %1934 = vmatprep.subr.bf16.mxu0 %v2032_v3  ;;  %2011 = vmatprep.subr.bf16.mxu1 %v2032_v3  ;;  %v2061_v32 = vld [vmem:[#allocation3 + $0x60] sm:$0xff]   ;;  %v2063_v34 = vld [vmem:[#allocation3 + $0x68] sm:$0xff]   ;;  %v2065_v36 = vld [vmem:[#allocation3 + $0x70] sm:$0xff]  }
  0x28   :  { %v2062_v33 = vld [vmem:[#allocation3 + $0xe0] sm:$0xff]   ;;  %v2064_v35 = vld [vmem:[#allocation3 + $0xe8] sm:$0xff]   ;;  %v2066_v37 = vld [vmem:[#allocation3 + $0xf0] sm:$0xff]  }
  0x29   :  { %v2067_v38 = vld [vmem:[#allocation3 + $0x78] sm:$0xff]   ;;  %v2180_v40 = vld [vmem:[%s2323_s2] ss:$0 sm:$0xff]  ;;  %s2139_s2 = smov [#allocation8]  }
  0x2a   :  { %1935 = vmatpush3.bf16.msra.mxu0 %v2032_v3  ;;  %2019 = vmatpush3.bf16.msra.mxu1 %v2032_v3  ;;  %v2068_v39 = vld [vmem:[#allocation3 + $0xf8] sm:$0xff]   ;;  %v2187_v45 = vld [vmem:[%s2324_s3] ss:$0 sm:$0xff]  ;;  %s1514_s3 = sshll.u32 %s2139_s2, 4  ;;  %s1515_s3 = int_to_ptr.vmem [resolvable:$true] %s1514_s3 }
  0x2b   :  { %1936 = vmatprep.subr.bf16.mxu0 %v2033_v6  ;;  %2012 = vmatprep.subr.bf16.mxu1 %v2033_v6  ;;  %s2109_s29 = scalar_lea.vmem %s1515_s3, 4096  ;;  %p2114_p11 = scmp.lt.s32.totalorder %s1515_s3, %s1515_s3 }
  0x2c   :  { %p2110_p10 = scmp.ne.s32.totalorder %s1515_s3, %s2109_s29  ;;  %p2115_p12 = scmp.lt.s32.totalorder %s2109_s29, %s2109_s29 }
  0x2e   :  { %1937 = vmatpush3.bf16.msra.mxu0 %v2033_v6  ;;  %2020 = vmatpush3.bf16.msra.mxu1 %v2033_v6  ;;  %p2116_p13 = por %p2115_p12, %p2114_p11 }
  0x2f   :  { %1938 = vmatprep.subr.bf16.mxu0 %v2034_v7  ;;  %2013 = vmatprep.subr.bf16.mxu1 %v2034_v7 }
  0x30   :  { %p2117_p0 = pnand %p2116_p13, %p2110_p10 }
  0x32   :  { %1939 = vmatpush3.bf16.msra.mxu0 %v2034_v7  ;;  %2021 = vmatpush3.bf16.msra.mxu1 %v2034_v7 }
  0x33   :  { %1940 = vmatprep.subr.bf16.mxu0 %v2035_v8  ;;  %2014 = vmatprep.subr.bf16.mxu1 %v2035_v8 }
  0x36   :  { %1941 = vmatpush3.bf16.msra.mxu0 %v2035_v8  ;;  %2022 = vmatpush3.bf16.msra.mxu1 %v2035_v8 }
  0x37   :  { %1942 = vmatprep.subr.bf16.mxu0 %v2036_v9  ;;  %2015 = vmatprep.subr.bf16.mxu1 %v2036_v9 }
  0x3a   :  { %1943 = vmatpush3.bf16.msra.mxu0 %v2036_v9  ;;  %2023 = vmatpush3.bf16.msra.mxu1 %v2036_v9 }
  0x3d   :  { %1945 = vmatmul.mubr.bf16.vlgmr.msra.gmra.mxu0 %v2039_v10  ;;  %1977 = vmatmul.mubr.bf16.vlgmr.msra.gmra.mxu1 %v2040_v11 }
  0x3e   :  { %1948 = vmatprep.mubr.bf16.mxu0 %v2041_v12  ;;  %1980 = vmatprep.mubr.bf16.mxu1 %v2042_v13 }
  0x45   :  { %1949 = vmatmul.mubr.bf16.gmra.mxu0 %v2043_v14  ;;  %1981 = vmatmul.mubr.bf16.gmra.mxu1 %v2044_v15 }
  0x46   :  { %1952 = vmatprep.mubr.bf16.mxu0 %v2045_v16  ;;  %1984 = vmatprep.mubr.bf16.mxu1 %v2046_v17 }
  0x4d   :  { %1953 = vmatmul.mubr.bf16.gmra.mxu0 %v2047_v18  ;;  %1985 = vmatmul.mubr.bf16.gmra.mxu1 %v2048_v19 }
  0x4e   :  { %1956 = vmatprep.mubr.bf16.mxu0 %v2049_v20  ;;  %1988 = vmatprep.mubr.bf16.mxu1 %v2050_v21 }
  0x55   :  { %1957 = vmatmul.mubr.bf16.gmra.mxu0 %v2051_v22  ;;  %1989 = vmatmul.mubr.bf16.gmra.mxu1 %v2052_v23 }
  0x56   :  { %1960 = vmatprep.mubr.bf16.mxu0 %v2053_v24  ;;  %1992 = vmatprep.mubr.bf16.mxu1 %v2054_v25 }
  0x5d   :  { %1961 = vmatmul.mubr.bf16.gmra.mxu0 %v2055_v26  ;;  %1993 = vmatmul.mubr.bf16.gmra.mxu1 %v2056_v27 }
  0x5e   :  { %1964 = vmatprep.mubr.bf16.mxu0 %v2057_v28  ;;  %1996 = vmatprep.mubr.bf16.mxu1 %v2058_v29 }
  0x65   :  { %1965 = vmatmul.mubr.bf16.gmra.mxu0 %v2059_v30  ;;  %1997 = vmatmul.mubr.bf16.gmra.mxu1 %v2060_v31 }
  0x66   :  { %1968 = vmatprep.mubr.bf16.mxu0 %v2061_v32  ;;  %2000 = vmatprep.mubr.bf16.mxu1 %v2062_v33 }
  0x6d   :  { %1969 = vmatmul.mubr.bf16.gmra.mxu0 %v2063_v34  ;;  %2001 = vmatmul.mubr.bf16.gmra.mxu1 %v2064_v35 }
  0x6e   :  { %1972 = vmatprep.mubr.bf16.mxu0 %v2065_v36  ;;  %2004 = vmatprep.mubr.bf16.mxu1 %v2066_v37 }
  0x75   :  { %1973 = vmatmul.mubr.bf16.gmra.mxu0 %v2067_v38  ;;  %2005 = vmatmul.mubr.bf16.gmra.mxu1 %v2068_v39 }
  0xfd   :  { %v1946_v41 = vpop.f32.mrf.mxu0  ;;  %v1978_v42 = vpop.f32.mrf.mxu1 }
  0xfe   :  { %v992_v43 = vmul.f32 %v1946_v41, %v2180_v40  ;;  %v1024_v44 = vmul.f32 %v1978_v42, %v2180_v40 }
  0xff   :  { %v533_v46 = vpop.f32.mrf.mxu0  ;;  %v661_v47 = vpop.f32.mrf.mxu1 }
 0x100   :  { %v990_v48 = vmul.f32 %v2180_v40, %v533_v46  ;;  %v1022_v49 = vmul.f32 %v2180_v40, %v661_v47  ;;  %v1063_v52 = vadd.f32 %v2187_v45, %v992_v43  ;;  %v1095_v53 = vadd.f32 %v2187_v45, %v1024_v44 }
 0x101   :  { %v1947_v50 = vpop.f32.mrf.mxu0  ;;  %v1979_v51 = vpop.f32.mrf.mxu1 }
 0x102   :  { %v993_v54 = vmul.f32 %v1947_v50, %v2180_v40  ;;  %v1025_v55 = vmul.f32 %v1979_v51, %v2180_v40  ;;  %v1061_v58 = vadd.f32 %v2187_v45, %v990_v48  ;;  %v1093_v59 = vadd.f32 %v2187_v45, %v1022_v49 }
 0x103   :  { %v536_v56 = vpop.f32.mrf.mxu0  ;;  %v664_v57 = vpop.f32.mrf.mxu1  ;;  %v1127_v2 = vmax.f32 %v1063_v52, 0.0  ;;  %v1159_v3 = vmax.f32 %v1095_v53, 0.0 }
 0x104   :  { %v991_v60 = vmul.f32 %v2180_v40, %v536_v56  ;;  %v1023_v61 = vmul.f32 %v2180_v40, %v664_v57  ;;  %v1064_v62 = vadd.f32 %v2187_v45, %v993_v54  ;;  %v1096_v63 = vadd.f32 %v2187_v45, %v1025_v55 }
 0x105   :  { %v1950_v0 = vpop.f32.mrf.mxu0  ;;  %v1982_v1 = vpop.f32.mrf.mxu1  ;;  %v1125_v12 = vmax.f32 %v1061_v58, 0.0  ;;  %v1157_v13 = vmax.f32 %v1093_v59, 0.0 }
 0x106   :  { %v1062_v4 = vadd.f32 %v2187_v45, %v991_v60  ;;  %v1094_v5 = vadd.f32 %v2187_v45, %v1023_v61  ;;  %v1128_v6 = vmax.f32 %v1064_v62, 0.0  ;;  %v1160_v7 = vmax.f32 %v1096_v63, 0.0 }
 0x107   :  { %v996_v8 = vmul.f32 %v1950_v0, %v2180_v40  ;;  %v1028_v9 = vmul.f32 %v1982_v1, %v2180_v40  ;;  %v549_v10 = vpop.f32.mrf.mxu0  ;;  %v677_v11 = vpop.f32.mrf.mxu1 }
 0x108   :  { %v1126_v14 = vmax.f32 %v1062_v4, 0.0  ;;  %v1158_v15 = vmax.f32 %v1094_v5, 0.0  ;;  %v1705_v16 = vpack.c.bf16 %v1128_v6, %v1127_v2  ;;  %v1785_v17 = vpack.c.bf16 %v1160_v7, %v1159_v3 }
 0x109   :  { %v994_v18 = vmul.f32 %v2180_v40, %v549_v10  ;;  %v1026_v19 = vmul.f32 %v2180_v40, %v677_v11  ;;  %v1951_v20 = vpop.f32.mrf.mxu0  ;;  %v1983_v21 = vpop.f32.mrf.mxu1  ;;  %v1067_v24 = vadd.f32 %v2187_v45, %v996_v8  ;;  %v1099_v25 = vadd.f32 %v2187_v45, %v1028_v9 }
 0x10a   :  { %v1700_v22 = vpack.c.bf16 %v1126_v14, %v1125_v12  ;;  %v1780_v23 = vpack.c.bf16 %v1158_v15, %v1157_v13  ;;  %1857 = vst [vmem:[#allocation8 + $0x8] sm:$0xff] %v1705_v16   ;;  %1873 = vst [vmem:[#allocation8 + $0x88] sm:$0xff] %v1785_v17   ;;  %v997_v26 = vmul.f32 %v1951_v20, %v2180_v40 }
 0x10b   :  { %v1029_v27 = vmul.f32 %v1983_v21, %v2180_v40  ;;  %v552_v28 = vpop.f32.mrf.mxu0  ;;  %v680_v29 = vpop.f32.mrf.mxu1  ;;  %v1065_v30 = vadd.f32 %v2187_v45, %v994_v18  ;;  %v1097_v31 = vadd.f32 %v2187_v45, %v1026_v19  ;;  %v1131_v43 = vmax.f32 %v1067_v24, 0.0 }
 0x10c   :  { %1701 = vst [vmem:[#allocation8] sm:$0xff] %v1700_v22   ;;  %1872 = vst [vmem:[#allocation8 + $0x80] sm:$0xff] %v1780_v23   ;;  %v995_v32 = vmul.f32 %v2180_v40, %v552_v28  ;;  %v1027_v33 = vmul.f32 %v2180_v40, %v680_v29  ;;  %v1068_v34 = vadd.f32 %v2187_v45, %v997_v26  ;;  %v1163_v44 = vmax.f32 %v1099_v25, 0.0 }
 0x10d   :  { %v1100_v35 = vadd.f32 %v2187_v45, %v1029_v27  ;;  %v1954_v36 = vpop.f32.mrf.mxu0  ;;  %v1986_v37 = vpop.f32.mrf.mxu1  ;;  %v1129_v50 = vmax.f32 %v1065_v30, 0.0  ;;  %v1161_v51 = vmax.f32 %v1097_v31, 0.0 }
 0x10e   :  { %v1066_v38 = vadd.f32 %v2187_v45, %v995_v32  ;;  %v1098_v39 = vadd.f32 %v2187_v45, %v1027_v33  ;;  %v1000_v41 = vmul.f32 %v1954_v36, %v2180_v40  ;;  %v1032_v42 = vmul.f32 %v1986_v37, %v2180_v40 }
 0x10f   :  { %v1132_v46 = vmax.f32 %v1068_v34, 0.0  ;;  %v1164_v47 = vmax.f32 %v1100_v35, 0.0  ;;  %v565_v48 = vpop.f32.mrf.mxu0  ;;  %v693_v49 = vpop.f32.mrf.mxu1 }
 0x110   :  { %v1130_v52 = vmax.f32 %v1066_v38, 0.0  ;;  %v1162_v53 = vmax.f32 %v1098_v39, 0.0  ;;  %v998_v56 = vmul.f32 %v2180_v40, %v565_v48  ;;  %v1030_v57 = vmul.f32 %v2180_v40, %v693_v49 }
 0x111   :  { %v1715_v54 = vpack.c.bf16 %v1132_v46, %v1131_v43  ;;  %v1795_v55 = vpack.c.bf16 %v1164_v47, %v1163_v44  ;;  %v1955_v58 = vpop.f32.mrf.mxu0  ;;  %v1987_v59 = vpop.f32.mrf.mxu1  ;;  %v1071_v62 = vadd.f32 %v2187_v45, %v1000_v41  ;;  %v1103_v63 = vadd.f32 %v2187_v45, %v1032_v42 }
 0x112   :  { %v1710_v60 = vpack.c.bf16 %v1130_v52, %v1129_v50  ;;  %v1790_v61 = vpack.c.bf16 %v1162_v53, %v1161_v51  ;;  %v1001_v0 = vmul.f32 %v1955_v58, %v2180_v40  ;;  %v1033_v1 = vmul.f32 %v1987_v59, %v2180_v40 }
 0x113   :  { %1859 = vst [vmem:[#allocation8 + $0x18] sm:$0xff] %v1715_v54   ;;  %1875 = vst [vmem:[#allocation8 + $0x98] sm:$0xff] %v1795_v55   ;;  %v568_v2 = vpop.f32.mrf.mxu0  ;;  %v696_v3 = vpop.f32.mrf.mxu1  ;;  %v1069_v4 = vadd.f32 %v2187_v45, %v998_v56  ;;  %v1101_v5 = vadd.f32 %v2187_v45, %v1030_v57  ;;  %v1135_v12 = vmax.f32 %v1071_v62, 0.0  ;;  %v1167_v13 = vmax.f32 %v1103_v63, 0.0 }
 0x114   :  { %1858 = vst [vmem:[#allocation8 + $0x10] sm:$0xff] %v1710_v60   ;;  %1874 = vst [vmem:[#allocation8 + $0x90] sm:$0xff] %v1790_v61   ;;  %v999_v6 = vmul.f32 %v2180_v40, %v568_v2  ;;  %v1031_v7 = vmul.f32 %v2180_v40, %v696_v3  ;;  %v1072_v8 = vadd.f32 %v2187_v45, %v1001_v0 }
 0x115   :  { %v1104_v9 = vadd.f32 %v2187_v45, %v1033_v1  ;;  %v1958_v10 = vpop.f32.mrf.mxu0  ;;  %v1990_v11 = vpop.f32.mrf.mxu1  ;;  %v1133_v22 = vmax.f32 %v1069_v4, 0.0  ;;  %v1165_v23 = vmax.f32 %v1101_v5, 0.0 }
 0x116   :  { %v1070_v14 = vadd.f32 %v2187_v45, %v999_v6  ;;  %v1102_v15 = vadd.f32 %v2187_v45, %v1031_v7  ;;  %v1136_v16 = vmax.f32 %v1072_v8, 0.0  ;;  %v1004_v18 = vmul.f32 %v1958_v10, %v2180_v40 }
 0x117   :  { %v1168_v17 = vmax.f32 %v1104_v9, 0.0  ;;  %v1036_v19 = vmul.f32 %v1990_v11, %v2180_v40  ;;  %v581_v20 = vpop.f32.mrf.mxu0  ;;  %v709_v21 = vpop.f32.mrf.mxu1 }
 0x118   :  { %v1134_v24 = vmax.f32 %v1070_v14, 0.0  ;;  %v1166_v25 = vmax.f32 %v1102_v15, 0.0  ;;  %v1725_v26 = vpack.c.bf16 %v1136_v16, %v1135_v12  ;;  %v1002_v28 = vmul.f32 %v2180_v40, %v581_v20 }
 0x119   :  { %v1805_v27 = vpack.c.bf16 %v1168_v17, %v1167_v13  ;;  %v1034_v29 = vmul.f32 %v2180_v40, %v709_v21  ;;  %v1959_v30 = vpop.f32.mrf.mxu0  ;;  %v1991_v31 = vpop.f32.mrf.mxu1  ;;  %v1075_v34 = vadd.f32 %v2187_v45, %v1004_v18  ;;  %v1107_v35 = vadd.f32 %v2187_v45, %v1036_v19 }
 0x11a   :  { %v1720_v32 = vpack.c.bf16 %v1134_v24, %v1133_v22  ;;  %v1800_v33 = vpack.c.bf16 %v1166_v25, %v1165_v23  ;;  %1861 = vst [vmem:[#allocation8 + $0x28] sm:$0xff] %v1725_v26   ;;  %v1005_v36 = vmul.f32 %v1959_v30, %v2180_v40  ;;  %v1037_v37 = vmul.f32 %v1991_v31, %v2180_v40 }
 0x11b   :  { %1877 = vst [vmem:[#allocation8 + $0xa8] sm:$0xff] %v1805_v27   ;;  %v584_v38 = vpop.f32.mrf.mxu0  ;;  %v712_v39 = vpop.f32.mrf.mxu1  ;;  %v1073_v41 = vadd.f32 %v2187_v45, %v1002_v28  ;;  %v1105_v42 = vadd.f32 %v2187_v45, %v1034_v29  ;;  %v1139_v54 = vmax.f32 %v1075_v34, 0.0  ;;  %v1171_v55 = vmax.f32 %v1107_v35, 0.0 }
 0x11c   :  { %1860 = vst [vmem:[#allocation8 + $0x20] sm:$0xff] %v1720_v32   ;;  %1876 = vst [vmem:[#allocation8 + $0xa0] sm:$0xff] %v1800_v33   ;;  %v1003_v43 = vmul.f32 %v2180_v40, %v584_v38  ;;  %v1035_v44 = vmul.f32 %v2180_v40, %v712_v39  ;;  %v1076_v46 = vadd.f32 %v2187_v45, %v1005_v36 }
 0x11d   :  { %v1108_v47 = vadd.f32 %v2187_v45, %v1037_v37  ;;  %v1962_v48 = vpop.f32.mrf.mxu0  ;;  %v1994_v49 = vpop.f32.mrf.mxu1  ;;  %v1137_v60 = vmax.f32 %v1073_v41, 0.0  ;;  %v1169_v61 = vmax.f32 %v1105_v42, 0.0 }
 0x11e   :  { %v1074_v50 = vadd.f32 %v2187_v45, %v1003_v43  ;;  %v1106_v51 = vadd.f32 %v2187_v45, %v1035_v44  ;;  %v1008_v52 = vmul.f32 %v1962_v48, %v2180_v40  ;;  %v1040_v53 = vmul.f32 %v1994_v49, %v2180_v40 }
 0x11f   :  { %v1140_v56 = vmax.f32 %v1076_v46, 0.0  ;;  %v1172_v57 = vmax.f32 %v1108_v47, 0.0  ;;  %v597_v58 = vpop.f32.mrf.mxu0  ;;  %v725_v59 = vpop.f32.mrf.mxu1 }
 0x120   :  { %v1138_v62 = vmax.f32 %v1074_v50, 0.0  ;;  %v1170_v63 = vmax.f32 %v1106_v51, 0.0  ;;  %v1006_v2 = vmul.f32 %v2180_v40, %v597_v58  ;;  %v1038_v3 = vmul.f32 %v2180_v40, %v725_v59 }
 0x121   :  { %v1735_v0 = vpack.c.bf16 %v1140_v56, %v1139_v54  ;;  %v1815_v1 = vpack.c.bf16 %v1172_v57, %v1171_v55  ;;  %v1963_v4 = vpop.f32.mrf.mxu0  ;;  %v1995_v5 = vpop.f32.mrf.mxu1  ;;  %v1079_v8 = vadd.f32 %v2187_v45, %v1008_v52  ;;  %v1111_v9 = vadd.f32 %v2187_v45, %v1040_v53 }
 0x122   :  { %v1730_v6 = vpack.c.bf16 %v1138_v62, %v1137_v60  ;;  %v1810_v7 = vpack.c.bf16 %v1170_v63, %v1169_v61  ;;  %v1009_v10 = vmul.f32 %v1963_v4, %v2180_v40  ;;  %v1041_v11 = vmul.f32 %v1995_v5, %v2180_v40 }
 0x123   :  { %1863 = vst [vmem:[#allocation8 + $0x38] sm:$0xff] %v1735_v0   ;;  %1879 = vst [vmem:[#allocation8 + $0xb8] sm:$0xff] %v1815_v1   ;;  %v600_v12 = vpop.f32.mrf.mxu0  ;;  %v728_v13 = vpop.f32.mrf.mxu1  ;;  %v1077_v14 = vadd.f32 %v2187_v45, %v1006_v2  ;;  %v1109_v15 = vadd.f32 %v2187_v45, %v1038_v3  ;;  %v1143_v22 = vmax.f32 %v1079_v8, 0.0  ;;  %v1175_v23 = vmax.f32 %v1111_v9, 0.0 }
 0x124   :  { %1862 = vst [vmem:[#allocation8 + $0x30] sm:$0xff] %v1730_v6   ;;  %1878 = vst [vmem:[#allocation8 + $0xb0] sm:$0xff] %v1810_v7   ;;  %v1007_v16 = vmul.f32 %v2180_v40, %v600_v12  ;;  %v1039_v17 = vmul.f32 %v2180_v40, %v728_v13  ;;  %v1080_v18 = vadd.f32 %v2187_v45, %v1009_v10 }
 0x125   :  { %v1112_v19 = vadd.f32 %v2187_v45, %v1041_v11  ;;  %v1966_v20 = vpop.f32.mrf.mxu0  ;;  %v1998_v21 = vpop.f32.mrf.mxu1  ;;  %v1141_v32 = vmax.f32 %v1077_v14, 0.0  ;;  %v1173_v33 = vmax.f32 %v1109_v15, 0.0 }
 0x126   :  { %v1078_v24 = vadd.f32 %v2187_v45, %v1007_v16  ;;  %v1110_v25 = vadd.f32 %v2187_v45, %v1039_v17  ;;  %v1144_v26 = vmax.f32 %v1080_v18, 0.0  ;;  %v1012_v28 = vmul.f32 %v1966_v20, %v2180_v40 }
 0x127   :  { %v1176_v27 = vmax.f32 %v1112_v19, 0.0  ;;  %v1044_v29 = vmul.f32 %v1998_v21, %v2180_v40  ;;  %v613_v30 = vpop.f32.mrf.mxu0  ;;  %v741_v31 = vpop.f32.mrf.mxu1 }
 0x128   :  { %v1142_v34 = vmax.f32 %v1078_v24, 0.0  ;;  %v1174_v35 = vmax.f32 %v1110_v25, 0.0  ;;  %v1745_v36 = vpack.c.bf16 %v1144_v26, %v1143_v22  ;;  %v1010_v38 = vmul.f32 %v2180_v40, %v613_v30 }
 0x129   :  { %v1825_v37 = vpack.c.bf16 %v1176_v27, %v1175_v23  ;;  %v1042_v39 = vmul.f32 %v2180_v40, %v741_v31  ;;  %v1967_v41 = vpop.f32.mrf.mxu0  ;;  %v1999_v42 = vpop.f32.mrf.mxu1  ;;  %v1083_v46 = vadd.f32 %v2187_v45, %v1012_v28  ;;  %v1115_v47 = vadd.f32 %v2187_v45, %v1044_v29 }
 0x12a   :  { %v1740_v43 = vpack.c.bf16 %v1142_v34, %v1141_v32  ;;  %v1820_v44 = vpack.c.bf16 %v1174_v35, %v1173_v33  ;;  %1865 = vst [vmem:[#allocation8 + $0x48] sm:$0xff] %v1745_v36   ;;  %v1013_v48 = vmul.f32 %v1967_v41, %v2180_v40  ;;  %v1045_v49 = vmul.f32 %v1999_v42, %v2180_v40 }
 0x12b   :  { %1881 = vst [vmem:[#allocation8 + $0xc8] sm:$0xff] %v1825_v37   ;;  %v616_v50 = vpop.f32.mrf.mxu0  ;;  %v744_v51 = vpop.f32.mrf.mxu1  ;;  %v1081_v52 = vadd.f32 %v2187_v45, %v1010_v38  ;;  %v1113_v53 = vadd.f32 %v2187_v45, %v1042_v39  ;;  %v1147_v0 = vmax.f32 %v1083_v46, 0.0  ;;  %v1179_v1 = vmax.f32 %v1115_v47, 0.0 }
 0x12c   :  { %1864 = vst [vmem:[#allocation8 + $0x40] sm:$0xff] %v1740_v43   ;;  %1880 = vst [vmem:[#allocation8 + $0xc0] sm:$0xff] %v1820_v44   ;;  %v1011_v54 = vmul.f32 %v2180_v40, %v616_v50  ;;  %v1043_v55 = vmul.f32 %v2180_v40, %v744_v51  ;;  %v1084_v56 = vadd.f32 %v2187_v45, %v1013_v48 }
 0x12d   :  { %v1116_v57 = vadd.f32 %v2187_v45, %v1045_v49  ;;  %v1970_v58 = vpop.f32.mrf.mxu0  ;;  %v2002_v59 = vpop.f32.mrf.mxu1  ;;  %v1145_v6 = vmax.f32 %v1081_v52, 0.0  ;;  %v1177_v7 = vmax.f32 %v1113_v53, 0.0 }
 0x12e   :  { %v1082_v60 = vadd.f32 %v2187_v45, %v1011_v54  ;;  %v1114_v61 = vadd.f32 %v2187_v45, %v1043_v55  ;;  %v1016_v62 = vmul.f32 %v1970_v58, %v2180_v40  ;;  %v1048_v63 = vmul.f32 %v2002_v59, %v2180_v40 }
 0x12f   :  { %v1148_v2 = vmax.f32 %v1084_v56, 0.0  ;;  %v1180_v3 = vmax.f32 %v1116_v57, 0.0  ;;  %v629_v4 = vpop.f32.mrf.mxu0  ;;  %v757_v5 = vpop.f32.mrf.mxu1 }
 0x130   :  { %v1146_v8 = vmax.f32 %v1082_v60, 0.0  ;;  %v1178_v9 = vmax.f32 %v1114_v61, 0.0  ;;  %v1014_v12 = vmul.f32 %v2180_v40, %v629_v4  ;;  %v1046_v13 = vmul.f32 %v2180_v40, %v757_v5 }
 0x131   :  { %v1755_v10 = vpack.c.bf16 %v1148_v2, %v1147_v0  ;;  %v1835_v11 = vpack.c.bf16 %v1180_v3, %v1179_v1  ;;  %v1971_v14 = vpop.f32.mrf.mxu0  ;;  %v2003_v15 = vpop.f32.mrf.mxu1  ;;  %v1087_v18 = vadd.f32 %v2187_v45, %v1016_v62  ;;  %v1119_v19 = vadd.f32 %v2187_v45, %v1048_v63 }
 0x132   :  { %v1750_v16 = vpack.c.bf16 %v1146_v8, %v1145_v6  ;;  %v1830_v17 = vpack.c.bf16 %v1178_v9, %v1177_v7  ;;  %v1017_v20 = vmul.f32 %v1971_v14, %v2180_v40  ;;  %v1049_v21 = vmul.f32 %v2003_v15, %v2180_v40 }
 0x133   :  { %1867 = vst [vmem:[#allocation8 + $0x58] sm:$0xff] %v1755_v10   ;;  %1883 = vst [vmem:[#allocation8 + $0xd8] sm:$0xff] %v1835_v11   ;;  %v632_v22 = vpop.f32.mrf.mxu0  ;;  %v760_v23 = vpop.f32.mrf.mxu1  ;;  %v1085_v24 = vadd.f32 %v2187_v45, %v1014_v12  ;;  %v1117_v25 = vadd.f32 %v2187_v45, %v1046_v13  ;;  %v1151_v32 = vmax.f32 %v1087_v18, 0.0  ;;  %v1183_v33 = vmax.f32 %v1119_v19, 0.0 }
 0x134   :  { %1866 = vst [vmem:[#allocation8 + $0x50] sm:$0xff] %v1750_v16   ;;  %1882 = vst [vmem:[#allocation8 + $0xd0] sm:$0xff] %v1830_v17   ;;  %v1015_v26 = vmul.f32 %v2180_v40, %v632_v22  ;;  %v1047_v27 = vmul.f32 %v2180_v40, %v760_v23  ;;  %v1088_v28 = vadd.f32 %v2187_v45, %v1017_v20 }
 0x135   :  { %v1120_v29 = vadd.f32 %v2187_v45, %v1049_v21  ;;  %v1974_v30 = vpop.f32.mrf.mxu0  ;;  %v2006_v31 = vpop.f32.mrf.mxu1  ;;  %v1149_v43 = vmax.f32 %v1085_v24, 0.0  ;;  %v1181_v44 = vmax.f32 %v1117_v25, 0.0 }
 0x136   :  { %v1086_v34 = vadd.f32 %v2187_v45, %v1015_v26  ;;  %v1118_v35 = vadd.f32 %v2187_v45, %v1047_v27  ;;  %v1152_v36 = vmax.f32 %v1088_v28, 0.0  ;;  %v1020_v38 = vmul.f32 %v1974_v30, %v2180_v40 }
 0x137   :  { %v1184_v37 = vmax.f32 %v1120_v29, 0.0  ;;  %v1052_v39 = vmul.f32 %v2006_v31, %v2180_v40  ;;  %v645_v41 = vpop.f32.mrf.mxu0  ;;  %v773_v42 = vpop.f32.mrf.mxu1 }
 0x138   :  { %v1150_v46 = vmax.f32 %v1086_v34, 0.0  ;;  %v1182_v47 = vmax.f32 %v1118_v35, 0.0  ;;  %v1765_v48 = vpack.c.bf16 %v1152_v36, %v1151_v32  ;;  %v1018_v50 = vmul.f32 %v2180_v40, %v645_v41 }
 0x139   :  { %v1845_v49 = vpack.c.bf16 %v1184_v37, %v1183_v33  ;;  %v1050_v51 = vmul.f32 %v2180_v40, %v773_v42  ;;  %v1975_v52 = vpop.f32.mrf.mxu0  ;;  %v2007_v53 = vpop.f32.mrf.mxu1  ;;  %v1091_v56 = vadd.f32 %v2187_v45, %v1020_v38  ;;  %v1123_v57 = vadd.f32 %v2187_v45, %v1052_v39 }
 0x13a   :  { %v1760_v54 = vpack.c.bf16 %v1150_v46, %v1149_v43  ;;  %v1840_v55 = vpack.c.bf16 %v1182_v47, %v1181_v44  ;;  %1869 = vst [vmem:[#allocation8 + $0x68] sm:$0xff] %v1765_v48   ;;  %v1021_v58 = vmul.f32 %v1975_v52, %v2180_v40  ;;  %v1053_v59 = vmul.f32 %v2007_v53, %v2180_v40 }
 0x13b   :  { %1885 = vst [vmem:[#allocation8 + $0xe8] sm:$0xff] %v1845_v49   ;;  %v648_v60 = vpop.f32.mrf.mxu0  ;;  %v776_v61 = vpop.f32.mrf.mxu1  ;;  %v1089_v62 = vadd.f32 %v2187_v45, %v1018_v50  ;;  %v1121_v63 = vadd.f32 %v2187_v45, %v1050_v51  ;;  %v1155_v6 = vmax.f32 %v1091_v56, 0.0  ;;  %v1187_v7 = vmax.f32 %v1123_v57, 0.0 }
 0x13c   :  { %1868 = vst [vmem:[#allocation8 + $0x60] sm:$0xff] %v1760_v54   ;;  %1884 = vst [vmem:[#allocation8 + $0xe0] sm:$0xff] %v1840_v55   ;;  %v1019_v0 = vmul.f32 %v2180_v40, %v648_v60  ;;  %v1051_v1 = vmul.f32 %v2180_v40, %v776_v61  ;;  %v1092_v2 = vadd.f32 %v2187_v45, %v1021_v58 }
 0x13d   :  { %v1124_v3 = vadd.f32 %v2187_v45, %v1053_v59  ;;  %v1153_v10 = vmax.f32 %v1089_v62, 0.0  ;;  %v1185_v11 = vmax.f32 %v1121_v63, 0.0 }
 0x13e   :  { %v1090_v4 = vadd.f32 %v2187_v45, %v1019_v0  ;;  %v1122_v5 = vadd.f32 %v2187_v45, %v1051_v1  ;;  %v1156_v8 = vmax.f32 %v1092_v2, 0.0 }
 0x13f   :  { %v1188_v9 = vmax.f32 %v1124_v3, 0.0 }
 0x140   :  { %v1154_v12 = vmax.f32 %v1090_v4, 0.0  ;;  %v1186_v13 = vmax.f32 %v1122_v5, 0.0  ;;  %v1775_v14 = vpack.c.bf16 %v1156_v8, %v1155_v6 }
 0x141   :  { %v1855_v40 = vpack.c.bf16 %v1188_v9, %v1187_v7 }
 0x142   :  { %v1770_v15 = vpack.c.bf16 %v1154_v12, %v1153_v10  ;;  %v1850_v16 = vpack.c.bf16 %v1186_v13, %v1185_v11  ;;  %1871 = vst [vmem:[#allocation8 + $0x78] sm:$0xff] %v1775_v14  }
 0x143   :  { %1887 = vst [vmem:[#allocation8 + $0xf8] sm:$0xff] %v1855_v40  }
 0x144   :  { %1870 = vst [vmem:[#allocation8 + $0x70] sm:$0xff] %v1770_v15   ;;  %1886 = vst [vmem:[#allocation8 + $0xf0] sm:$0xff] %v1850_v16  }
 0x145   :  { %2120 = shalt.err (!%p2117_p0)
}
 0x146   :  { %1520 = dma.vmem_to_hbm [thread:$0]  %s1515_s3, 4096, %s2325_s4, [#allocation5], %s2136_s18, %s2136_s18, %s2137_s19  }
 0x147   :  { %2133 = dma.done.wait [#allocation5], 4096  }
 0x148   :  { %2134 = vsyncadd [#allocation5], 4294963200 }
 0x149   :  { %1524 = vsyncpa [#allocation4], 1 }
 0x14a   :  { %1525 = vsyncpa [#allocation7], 1 }
 0x14b   :  { %1526 = vsyncpa [#allocation5], 1 }

</bundles_post_ra>
